<compile_context>
chip_gen: v5e
topology: v5e:2x2
jax: 0.10.0
libtpu: 0.0.40
codegen_flags: <defaults>
</compile_context>

<pallas_src>
import numpy as np
import jax
import jax.numpy as jnp
from jax.experimental import pallas as pl
from jax.experimental.pallas import tpu as pltpu


_LANE_CANDIDATES = (512, 256, 128)
_TARGET_BLOCK_BYTES = 4 << 20  # ~4 MiB of payload per grid step, any dtype


# ----------------------------------------------------------------------------
# Kernel: one lane-dense (block_rows, lanes) slab per grid step, pure VPU.
# ----------------------------------------------------------------------------
def _h_sigmoid_kernel(x_ref, o_ref):
    x = x_ref[...]
    # relu6(x + 3) / 6  ==  clip(x + 3, 0, 6) * (1/6); mul instead of divide.
    o_ref[...] = (jnp.clip(x + 3.0, 0.0, 6.0) * (1.0 / 6.0)).astype(o_ref.dtype)


def _h_sigmoid_jnp(x):
    # Plain-JAX path for tiny tails / empty inputs (same math).
    return (jnp.clip(x + 3.0, 0.0, 6.0) * (1.0 / 6.0)).astype(x.dtype)


# ----------------------------------------------------------------------------
# Pallas call on a lane-dense 2-D slab (rows, lanes), lanes % 128 == 0.
# ----------------------------------------------------------------------------
def _h_sigmoid_2d(x2d):
    rows, lanes = x2d.shape
    itemsize = x2d.dtype.itemsize
    # Native sublane multiple per dtype: 8 (f32), 16 (bf16/f16), 32 (int8).
    sublane = max(8, 32 // max(itemsize, 1))

    # Equal-bytes blocks across dtypes: ~_TARGET_BLOCK_BYTES of payload each.
    target_rows = max(1, _TARGET_BLOCK_BYTES // (lanes * itemsize))
    if rows <= target_rows:
        # Single block covering the whole slab (block == full dims is legal
        # even when rows is not a sublane multiple).
        block_rows = rows
    else:
        block_rows = max(sublane, (target_rows // sublane) * sublane)

    grid = (pl.cdiv(rows, block_rows),)
    nbytes = rows * lanes * itemsize

    return pl.pallas_call(
        _h_sigmoid_kernel,
        out_shape=jax.ShapeDtypeStruct((rows, lanes), x2d.dtype),
        grid=grid,
        in_specs=[pl.BlockSpec((block_rows, lanes), lambda i: (i, 0))],
        out_specs=pl.BlockSpec((block_rows, lanes), lambda i: (i, 0)),
        compiler_params=pltpu.CompilerParams(
            dimension_semantics=("parallel",)),
        cost_estimate=pl.CostEstimate(
            flops=4 * rows * lanes,
            transcendentals=0,
            bytes_accessed=2 * nbytes),
    )(x2d)


# ----------------------------------------------------------------------------
# Wrapper: free reshape to a lane-dense slab -> kernel -> free reshape back.
# ----------------------------------------------------------------------------
def h_sigmoid(x):
    orig_shape = x.shape
    total = int(x.size)
    if total == 0:
        return x

    # Common case: total divides a lane-dense width exactly -> zero padding,
    # zero slicing, reshapes are pure metadata ops.
    lanes = next((c for c in _LANE_CANDIDATES if total % c == 0), None)
    if lanes is not None:
        out2d = _h_sigmoid_2d(x.reshape(total // lanes, lanes))
        return out2d.reshape(orig_shape)

    # Rare fallback: size not divisible by 128. Kernel handles the 128-aligned
    # bulk; the (<128-element) tail is computed with plain jnp.
    lanes = 128
    x_flat = x.reshape(-1)
    bulk = (total // lanes) * lanes
    if bulk == 0:
        return _h_sigmoid_jnp(x_flat).reshape(orig_shape)
    out_bulk = _h_sigmoid_2d(x_flat[:bulk].reshape(bulk // lanes, lanes))
    out_tail = _h_sigmoid_jnp(x_flat[bulk:])
    return jnp.concatenate([out_bulk.reshape(-1), out_tail]).reshape(orig_shape)


# ----------------------------------------------------------------------------
# Pure-JAX reference (same math) for a correctness check
# ----------------------------------------------------------------------------
def _reference(x):
    return jnp.clip(x + 3.0, 0.0, 6.0) / 6.0


if __name__ == "__main__":
    key = jax.random.PRNGKey(0)

    B, C, H, W = 2, 4, 16, 16
    # Scale so values span well past the [-3, 3] clipping knees.
    x = 4.0 * jax.random.normal(key, (B, C, H, W), jnp.float32)

    out = h_sigmoid(x)
    jax.block_until_ready(out)

    ref = _reference(x)
    assert out.shape == x.shape, out.shape
    assert out.dtype == x.dtype, out.dtype
    np.testing.assert_allclose(np.asarray(out), np.asarray(ref),
                               rtol=1e-6, atol=1e-6)
    print("KERNEL_OK")
</pallas_src>

<mosaic_0001>
module attributes {stable_mosaic.version = 11 : i64} {
  func.func @_h_sigmoid_kernel(%arg0: i32, %arg1: memref<4x512xf32, #tpu.memory_space<vmem>>, %arg2: memref<4x512xf32, #tpu.memory_space<vmem>>) attributes {dimension_semantics = [#tpu.dimension_semantics<parallel>], iteration_bounds = array<i64: 1>, scalar_prefetch = 0 : i64, scratch_operands = 0 : i64, tpu.core_type = #tpu.core_type<tc>, window_params = [{transform_indices = @transform_0, window_bounds = array<i64: 4, 512>}, {transform_indices = @transform_1, window_bounds = array<i64: 4, 512>}]} {
    %c0 = arith.constant 0 : index
    %c0_0 = arith.constant 0 : index
    %0 = vector.load %arg1[%c0, %c0_0] : memref<4x512xf32, #tpu.memory_space<vmem>>, vector<4x512xf32>
    %cst = arith.constant 3.000000e+00 : f32
    %1 = vector.broadcast %cst : f32 to vector<4x512xf32>
    %2 = arith.addf %0, %1 : vector<4x512xf32>
    %cst_1 = arith.constant 0.000000e+00 : f32
    %cst_2 = arith.constant 6.000000e+00 : f32
    %3 = vector.broadcast %cst_1 : f32 to vector<4x512xf32>
    %4 = arith.maximumf %3, %2 : vector<4x512xf32>
    %5 = vector.broadcast %cst_2 : f32 to vector<4x512xf32>
    %6 = arith.minimumf %5, %4 : vector<4x512xf32>
    %cst_3 = arith.constant 0.166666672 : f32
    %7 = vector.broadcast %cst_3 : f32 to vector<4x512xf32>
    %8 = arith.mulf %6, %7 : vector<4x512xf32>
    %c0_4 = arith.constant 0 : index
    %c0_5 = arith.constant 0 : index
    %9 = vector.load %arg2[%c0_4, %c0_5] : memref<4x512xf32, #tpu.memory_space<vmem>>, vector<4x512xf32>
    tpu.vector_store %arg2[%c0_4, %c0_5], %8 {strides = array<i32>} : memref<4x512xf32, #tpu.memory_space<vmem>>, vector<4x512xf32>,
    return
  }
  func.func @transform_0(%arg0: i32) -> (i32, i32) {
    %c0_i32 = arith.constant 0 : i32
    %c0_i32_0 = arith.constant 0 : i32
    return %arg0, %c0_i32 : i32, i32
  }
  func.func @transform_1(%arg0: i32) -> (i32, i32) {
    %c0_i32 = arith.constant 0 : i32
    %c0_i32_0 = arith.constant 0 : i32
    return %arg0, %c0_i32 : i32, i32
  }
}

</mosaic_0001>

<bundles_post_ra>
// kernel: tpu_custom_call.1
= control target key start
LH: loop header
LB: loop body
LE: loop exit
PB: predicated region body
PF: predicated region fallthrough
CT: control target
= control target key end

     0   :  { %6 = vsyncpa [#allocation3], 0  ;;  %s124_s0 = inlined_call_operand.hbm [shape: f32[4,512], index: 0, kind: input, shape index: {}]   ;;  %s125_s1 = inlined_call_operand.hbm [shape: f32[4,512], index: 1, kind: output, shape index: {}]  }
   0x1   :  { %7 = vsyncpa [#allocation4], 0  ;;  %s13_s8 = sshll.u32 %s124_s0, 4  ;;  %s106_s9 = smov [#allocation2]   ;;  %s14_s8 = int_to_ptr.hbm [resolvable:$true] %s13_s8 }
   0x2   :  { %s15_s10 = sshll.u32 %s106_s9, 4  ;;  %s16_s10 = int_to_ptr.vmem [resolvable:$true] %s15_s10 }
   0x3   :  { %18 = dma.hbm_to_vmem [thread:$0]  %s14_s8, 256, %s16_s10, [#allocation3]  }
   0x4   :  { %102 = dma.done.wait [#allocation3], 256  }
   0x5   :  { %103 = vsyncadd [#allocation3], 4294967040  ;;  %v23_v0 = vld [vmem:[#allocation2] sm:$0xff]  ;;  %v24_v1 = vld [vmem:[#allocation2 + $0x8] sm:$0xff]  ;;  %s107_s11 = smov [#allocation5]   ;;  %s42_s0 = sshll.u32 %s125_s1, 4  ;;  %s43_s0 = int_to_ptr.hbm [resolvable:$true] %s42_s0 }
   0x6   :  { %v25_v2 = vadd.f32 3.0, %v23_v0  ;;  %v26_v3 = vadd.f32 3.0, %v24_v1  ;;  %s40_s12 = sshll.u32 %s107_s11, 4  ;;  %s41_s12 = int_to_ptr.vmem [resolvable:$true] %s40_s12 }
   0x8   :  { %v27_v4 = vmax.f32 %v25_v2, 0.0  ;;  %v28_v5 = vmax.f32 %v26_v3, 0.0 }
   0xa   :  { %v29_v6 = vmin.f32 %v27_v4, 6.0  ;;  %v30_v7 = vmin.f32 %v28_v5, 6.0 }
   0xc   :  { %v31_v8 = vmul.f32 0.16666667, %v29_v6  ;;  %v32_v9 = vmul.f32 0.16666667, %v30_v7 }
   0xe   :  { %33 = vst [vmem:[#allocation5] sm:$0xff] %v31_v8 }
   0xf   :  { %34 = vst [vmem:[#allocation5 + $0x8] sm:$0xff] %v32_v9 }
  0x10   :  { %45 = dma.vmem_to_hbm [thread:$0]  %s41_s12, 256, %s43_s0, [#allocation4]  }
  0x11   :  { %104 = dma.done.wait [#allocation4], 256  }
  0x12   :  { %105 = vsyncadd [#allocation4], 4294967040 }
  0x13   :  { %50 = vsyncpa [#allocation3], 1 }
  0x14   :  { %51 = vsyncpa [#allocation4], 1 }

</bundles_post_ra>
